<compile_context>
chip_gen: v6e
topology: v6e:2x2x1
jax: 0.10.0
libtpu: 0.0.40
codegen_flags: <defaults>
</compile_context>

<pallas_src>
import jax
import jax.numpy as jnp
from jax import lax
from jax.experimental import pallas as pl
from jax.experimental.pallas import tpu as pltpu

_TARGET_TILE_BYTES = 2 * 1024 * 1024   # per input, per pipeline buffer (v5e-safe)


def _to_2d(x):
    """Lane-dense 2D view [rows, cols].  Zero-copy (reshape only) whenever the
    element count is a multiple of 128; otherwise a single zero-pad copy in the
    ORIGINAL dtype (padded elements are masked out in-kernel).
    Returns (x2d, n_valid)."""
    n = x.size
    flat = x.reshape(-1)
    for cols in (512, 256, 128):
        if n % cols == 0:
            return flat.reshape(n // cols, cols), n
    cols = 512
    rows = -(-n // cols)
    flat = jnp.pad(flat, (0, rows * cols - n))   # ragged-tail case only; no astype
    return flat.reshape(rows, cols), n


def _pick_tm(rows, cols, block_rows):
    """Row-block size: multiple of 8 (or the full row dim), ~_TARGET_TILE_BYTES."""
    if rows <= 8:
        return rows                               # full (small) row dim is allowed
    if block_rows is None:
        block_rows = max(8, _TARGET_TILE_BYTES // (cols * 4))
    tm = max(8, (block_rows // 8) * 8)
    return min(tm, (rows // 8) * 8)


def _make_sq_sum_kernel(n_in, targets, n_valids, shape2d, tm):
    """Build a kernel computing sum((x_k - targets[k])^2) for n_in same-shaped
    inputs.  Refs: n_in input tiles (tm, C), one SMEM output (n_in,), n_in VMEM
    vector accumulators.  Grid axis 0 iterates over row blocks (reduction)."""
    rows, C = shape2d
    fold = (tm % 8 == 0) and (tm > 8)
    # Mask is needed if there are padded elements or a partial last row block.
    needs_mask = tuple((nv != rows * C) or (rows % tm != 0) for nv in n_valids)
    any_mask = any(needs_mask)

    def kernel(*refs):
        in_refs = refs[:n_in]
        out_ref = refs[n_in]
        acc_refs = refs[n_in + 1:]
        i = pl.program_id(0)

        @pl.when(i == 0)
        def _init():
            for acc in acc_refs:
                acc[...] = jnp.zeros_like(acc)

        if any_mask:
            # Global flat element index of every tile element (int32 is fine
            # for inputs below ~2^31 elements).
            row = lax.broadcasted_iota(jnp.int32, (tm, C), 0)
            col = lax.broadcasted_iota(jnp.int32, (tm, C), 1)
            gidx = (i * tm + row) * C + col

        for k in range(n_in):
            x = in_refs[k][...].astype(jnp.float32)      # bf16 -> f32 in-kernel
            d = x - jnp.float32(targets[k]) if targets[k] != 0.0 else x
            if needs_mask[k]:
                d = jnp.where(gidx < n_valids[k], d, 0.0)
            sq = d * d
            if fold:
                # Fold (tm, C) -> (8, C): sublane-aligned reshape + VPU adds only.
                part = jnp.sum(sq.reshape(tm // 8, 8, C), axis=0)
            else:
                part = sq
            acc_refs[k][...] += part

        @pl.when(i == pl.num_programs(0) - 1)
        def _finalize():
            for k in range(n_in):
                out_ref[k] = jnp.sum(acc_refs[k][...])   # one XLU reduce per input

    return kernel


def _sq_err_sums(tensors, targets, block_rows=None):
    """sum((x - target)^2) per tensor.  Tensors whose 2D views share a shape are
    fused into one pallas_call; otherwise each gets its own call (no padding a
    smaller tensor up to a larger one)."""
    views = [_to_2d(t) for t in tensors]
    if len({v[0].shape for v in views}) == 1:
        groups = [list(range(len(tensors)))]
    else:
        groups = [[k] for k in range(len(tensors))]

    sums = [None] * len(tensors)
    for grp in groups:
        x2ds = [views[k][0] for k in grp]
        nvs = tuple(views[k][1] for k in grp)
        tgts = tuple(targets[k] for k in grp)
        rows, cols = x2ds[0].shape
        tm = _pick_tm(rows, cols, block_rows)
        n_in = len(grp)
        acc_rows = 8 if tm % 8 == 0 else tm

        out = pl.pallas_call(
            _make_sq_sum_kernel(n_in, tgts, nvs, (rows, cols), tm),
            out_shape=jax.ShapeDtypeStruct((n_in,), jnp.float32),
            grid_spec=pltpu.PrefetchScalarGridSpec(
                num_scalar_prefetch=0,
                grid=(pl.cdiv(rows, tm),),
                in_specs=[pl.BlockSpec((tm, cols), lambda i: (i, 0))
                          for _ in grp],
                out_specs=pl.BlockSpec(memory_space=pltpu.MemorySpace.SMEM),
                scratch_shapes=[pltpu.VMEM((acc_rows, cols), jnp.float32)
                                for _ in grp]),
            compiler_params=pltpu.CompilerParams(
                dimension_semantics=("arbitrary",)),    # grid axis is a reduction
        )(*x2ds)
        for slot, k in enumerate(grp):
            sums[k] = out[slot]
    return sums


def msed_loss(score_fake, score_real, reduction="mean", block_rows=None):
    """Forward of MSEDLoss: returns (loss_d, loss_fake, loss_real)."""
    assert reduction in ("mean", "batch"), "reduction can only be 'mean' or 'batch'"

    if reduction == "batch":
        # TODO(synk): the 'batch' reduction (torch.mean(..., dim=1)) stays in plain
        # JAX -- it is a tiny per-sample mean not worth a separate Pallas launch.
        lf = jnp.mean(jnp.square(score_fake.astype(jnp.float32)), axis=1)
        lr = jnp.mean(jnp.square(score_real.astype(jnp.float32) - 1.0), axis=1)
        return lr + lf, lf, lr

    s_fake, s_real = _sq_err_sums([score_fake, score_real], [0.0, 1.0],
                                  block_rows=block_rows)
    loss_fake = s_fake / score_fake.size
    loss_real = s_real / score_real.size
    loss_d = loss_real + loss_fake
    return loss_d, loss_fake, loss_real


if __name__ == "__main__":
    key = jax.random.PRNGKey(0)
    k1, k2, k3, k4 = jax.random.split(key, 4)

    def ref_losses(f, r):
        lf = jnp.mean(jnp.square(f.astype(jnp.float32)))
        lr = jnp.mean(jnp.square(r.astype(jnp.float32) - 1.0))
        return lr + lf, lf, lr

    def check(got, want, tol=3e-5):
        for g, w in zip(got, want):
            g, w = float(g), float(w)
            assert abs(g - w) <= tol * max(1.0, abs(w)), (g, w)

    # 1) 128-aligned element counts -> zero-copy reshape path, fused single launch.
    sf = jax.random.normal(k1, (2, 1, 8192), jnp.float32)
    sr = 1.0 + 0.1 * jax.random.normal(k2, (2, 1, 8192), jnp.float32)
    out = jax.tree_util.tree_map(jax.block_until_ready, msed_loss(sf, sr))
    check(out, ref_losses(sf, sr))

    # Small row blocks to exercise the multi-step accumulator grid.
    out = jax.tree_util.tree_map(jax.block_until_ready,
                                 msed_loss(sf, sr, block_rows=8))
    check(out, ref_losses(sf, sr))

    # 2) Ragged element count (not a multiple of 128) -> in-kernel tail masking
    #    plus a partial last row block.
    sf2 = jax.random.normal(k3, (2, 1, 3000), jnp.float32)
    sr2 = 1.0 + 0.1 * jax.random.normal(k4, (2, 1, 3000), jnp.float32)
    out = jax.tree_util.tree_map(jax.block_until_ready, msed_loss(sf2, sr2))
    check(out, ref_losses(sf2, sr2))

    # 3) bf16 inputs streamed as bf16 (cast in-kernel), mismatched sizes -> unfused.
    sf3 = jax.random.normal(k1, (4, 512), jnp.bfloat16)
    sr3 = (1.0 + 0.1 * jax.random.normal(k2, (2, 768))).astype(jnp.bfloat16)
    out = jax.tree_util.tree_map(jax.block_until_ready, msed_loss(sf3, sr3))
    check(out, ref_losses(sf3, sr3), tol=1e-3)

    # 4) 'batch' reduction path (plain JAX, per-sample means over dim=1).
    ld_b, lf_b, lr_b = msed_loss(sf[:, 0, :], sr[:, 0, :], reduction="batch")
    jax.block_until_ready(ld_b)
    assert ld_b.shape == (2,)

    print("KERNEL_OK")
</pallas_src>

<mosaic_0001>
module attributes {stable_mosaic.version = 11 : i64} {
  func.func @kernel(%arg0: i32, %arg1: memref<32x512xf32, #tpu.memory_space<vmem>>, %arg2: memref<32x512xf32, #tpu.memory_space<vmem>>, %arg3: memref<2xf32, #tpu.memory_space<smem>>, %arg4: memref<8x512xf32, #tpu.memory_space<vmem>>, %arg5: memref<8x512xf32, #tpu.memory_space<vmem>>) attributes {dimension_semantics = [#tpu.dimension_semantics<arbitrary>], iteration_bounds = array<i64: 1>, scalar_prefetch = 0 : i64, scratch_operands = 2 : i64, tpu.core_type = #tpu.core_type<tc>, window_params = [{transform_indices = @transform_0, window_bounds = array<i64: 32, 512>}, {transform_indices = @transform_1, window_bounds = array<i64: 32, 512>}, {transform_indices = @transform_2, window_bounds = array<i64: 2>}]} {
    %c0_i32 = arith.constant 0 : i32
    %0 = arith.cmpi eq, %arg0, %c0_i32 : i32
    %1 = arith.extui %0 : i1 to i32
    %c0_i32_0 = arith.constant 0 : i32
    %2 = arith.cmpi ne, %1, %c0_i32_0 : i32
    scf.if %2 {
      %cst_16 = arith.constant 0.000000e+00 : f32
      %22 = vector.broadcast %cst_16 : f32 to vector<8x512xf32>
      %c0_17 = arith.constant 0 : index
      %c0_18 = arith.constant 0 : index
      %23 = vector.load %arg4[%c0_17, %c0_18] : memref<8x512xf32, #tpu.memory_space<vmem>>, vector<8x512xf32>
      tpu.vector_store %arg4[%c0_17, %c0_18], %22 {strides = array<i32>} : memref<8x512xf32, #tpu.memory_space<vmem>>, vector<8x512xf32>,
      %cst_19 = arith.constant 0.000000e+00 : f32
      %24 = vector.broadcast %cst_19 : f32 to vector<8x512xf32>
      %c0_20 = arith.constant 0 : index
      %c0_21 = arith.constant 0 : index
      %25 = vector.load %arg5[%c0_20, %c0_21] : memref<8x512xf32, #tpu.memory_space<vmem>>, vector<8x512xf32>
      tpu.vector_store %arg5[%c0_20, %c0_21], %24 {strides = array<i32>} : memref<8x512xf32, #tpu.memory_space<vmem>>, vector<8x512xf32>,
    } else {
    }
    %c0 = arith.constant 0 : index
    %c0_1 = arith.constant 0 : index
    %3 = vector.load %arg1[%c0, %c0_1] : memref<32x512xf32, #tpu.memory_space<vmem>>, vector<32x512xf32>
    %4 = arith.mulf %3, %3 : vector<32x512xf32>
    %5 = vector.shape_cast %4 : vector<32x512xf32> to vector<4x8x512xf32>
    %cst = arith.constant dense<0.000000e+00> : vector<8x512xf32>
    %6 = vector.multi_reduction <add>, %5, %cst [0] : vector<4x8x512xf32> to vector<8x512xf32>
    %c0_2 = arith.constant 0 : index
    %c0_3 = arith.constant 0 : index
    %7 = vector.load %arg4[%c0_2, %c0_3] : memref<8x512xf32, #tpu.memory_space<vmem>>, vector<8x512xf32>
    %8 = arith.addf %7, %6 : vector<8x512xf32>
    %c0_4 = arith.constant 0 : index
    %c0_5 = arith.constant 0 : index
    %9 = vector.load %arg4[%c0_4, %c0_5] : memref<8x512xf32, #tpu.memory_space<vmem>>, vector<8x512xf32>
    tpu.vector_store %arg4[%c0_4, %c0_5], %8 {strides = array<i32>} : memref<8x512xf32, #tpu.memory_space<vmem>>, vector<8x512xf32>,
    %c0_6 = arith.constant 0 : index
    %c0_7 = arith.constant 0 : index
    %10 = vector.load %arg2[%c0_6, %c0_7] : memref<32x512xf32, #tpu.memory_space<vmem>>, vector<32x512xf32>
    %cst_8 = arith.constant 1.000000e+00 : f32
    %11 = vector.broadcast %cst_8 : f32 to vector<32x512xf32>
    %12 = arith.subf %10, %11 : vector<32x512xf32>
    %13 = arith.mulf %12, %12 : vector<32x512xf32>
    %14 = vector.shape_cast %13 : vector<32x512xf32> to vector<4x8x512xf32>
    %cst_9 = arith.constant dense<0.000000e+00> : vector<8x512xf32>
    %15 = vector.multi_reduction <add>, %14, %cst_9 [0] : vector<4x8x512xf32> to vector<8x512xf32>
    %c0_10 = arith.constant 0 : index
    %c0_11 = arith.constant 0 : index
    %16 = vector.load %arg5[%c0_10, %c0_11] : memref<8x512xf32, #tpu.memory_space<vmem>>, vector<8x512xf32>
    %17 = arith.addf %16, %15 : vector<8x512xf32>
    %c0_12 = arith.constant 0 : index
    %c0_13 = arith.constant 0 : index
    %18 = vector.load %arg5[%c0_12, %c0_13] : memref<8x512xf32, #tpu.memory_space<vmem>>, vector<8x512xf32>
    tpu.vector_store %arg5[%c0_12, %c0_13], %17 {strides = array<i32>} : memref<8x512xf32, #tpu.memory_space<vmem>>, vector<8x512xf32>,
    %c0_i32_14 = arith.constant 0 : i32
    %19 = arith.cmpi eq, %arg0, %c0_i32_14 : i32
    %20 = arith.extui %19 : i1 to i32
    %c0_i32_15 = arith.constant 0 : i32
    %21 = arith.cmpi ne, %20, %c0_i32_15 : i32
    scf.if %21 {
      %c0_16 = arith.constant 0 : index
      %c0_17 = arith.constant 0 : index
      %22 = vector.load %arg4[%c0_16, %c0_17] : memref<8x512xf32, #tpu.memory_space<vmem>>, vector<8x512xf32>
      %23 = vector.shape_cast %22 : vector<8x512xf32> to vector<1x8x512xf32>
      %cst_18 = arith.constant dense<0.000000e+00> : vector<1xf32>
      %24 = vector.multi_reduction <add>, %23, %cst_18 [1, 2] : vector<1x8x512xf32> to vector<1xf32>
      %25 = vector.shape_cast %24 : vector<1xf32> to vector<1x1x1xf32>
      %26 = vector.extract %25[0, 0, 0] : f32 from vector<1x1x1xf32>
      %c0_19 = arith.constant 0 : index
      %27 = memref.load %arg3[%c0_19] : memref<2xf32, #tpu.memory_space<smem>>
      memref.store %26, %arg3[%c0_19] : memref<2xf32, #tpu.memory_space<smem>>
      %c0_20 = arith.constant 0 : index
      %c0_21 = arith.constant 0 : index
      %28 = vector.load %arg5[%c0_20, %c0_21] : memref<8x512xf32, #tpu.memory_space<vmem>>, vector<8x512xf32>
      %29 = vector.shape_cast %28 : vector<8x512xf32> to vector<1x8x512xf32>
      %cst_22 = arith.constant dense<0.000000e+00> : vector<1xf32>
      %30 = vector.multi_reduction <add>, %29, %cst_22 [1, 2] : vector<1x8x512xf32> to vector<1xf32>
      %31 = vector.shape_cast %30 : vector<1xf32> to vector<1x1x1xf32>
      %32 = vector.extract %31[0, 0, 0] : f32 from vector<1x1x1xf32>
      %c1 = arith.constant 1 : index
      %33 = memref.load %arg3[%c1] : memref<2xf32, #tpu.memory_space<smem>>
      memref.store %32, %arg3[%c1] : memref<2xf32, #tpu.memory_space<smem>>
    } else {
    }
    return
  }
  func.func @transform_0(%arg0: i32) -> (i32, i32) {
    %c0_i32 = arith.constant 0 : i32
    %c0_i32_0 = arith.constant 0 : i32
    return %arg0, %c0_i32 : i32, i32
  }
  func.func @transform_1(%arg0: i32) -> (i32, i32) {
    %c0_i32 = arith.constant 0 : i32
    %c0_i32_0 = arith.constant 0 : i32
    return %arg0, %c0_i32 : i32, i32
  }
  func.func @transform_2(%arg0: i32) -> i32 {
    %c0_i32 = arith.constant 0 : i32
    %c0_i32_0 = arith.constant 0 : i32
    return %c0_i32 : i32
  }
}

</mosaic_0001>

<bundles_post_ra>
// kernel: tpu_custom_call.1
= control target key start
LH: loop header
LB: loop body
LE: loop exit
PB: predicated region body
PF: predicated region fallthrough
CT: control target
= control target key end

     0   :  { %7 = vsyncpa [#allocation5], 0  ;;  %s342_s0 = inlined_call_operand.hbm [shape: f32[32,512], index: 0, kind: input, shape index: {}]   ;;  %s343_s1 = inlined_call_operand.hbm [shape: f32[32,512], index: 1, kind: input, shape index: {}]   ;;  %s344_s2 = inlined_call_operand.hbm [shape: f32[2], index: 2, kind: output, shape index: {}]  }
   0x1   :  { %8 = vsyncpa [#allocation8], 0 }
   0x2   :  { %9 = vsyncpa [#allocation6], 0  ;;  %s313_s9 = smov [#allocation4]  }
   0x3   :  { %s15_s10 = sshll.u32 %s313_s9, 4  ;;  %s16_s10 = int_to_ptr.vmem [resolvable:$true] %s15_s10 }
   0x4   :  { %s267_s11 = scalar_lea.vmem %s16_s10, 2048  ;;  %p272_p1 = scmp.lt.s32.totalorder %s16_s10, %s16_s10 }
   0x5   :  { %p268_p0 = scmp.ne.s32.totalorder %s16_s10, %s267_s11  ;;  %p273_p2 = scmp.lt.s32.totalorder %s267_s11, %s267_s11 }
   0x7   :  { %p274_p3 = por %p273_p2, %p272_p1 }
   0x9   :  { %p275_p4 = pnand %p274_p3, %p268_p0 }
   0xb   :  { %278 = shalt.err (!%p275_p4)
}
   0xc   :  { %s314_s12 = smov 512   ;;  %s315_s13 = smov 32  }
   0xd   :  { %21 = dma.hbm_to_vmem [thread:$0]  %s342_s0, 2048, %s16_s10, [#allocation5], %s314_s12, %s314_s12, %s315_s13  }
   0xe   :  { %s316_s16 = smov [#allocation7]  }
   0xf   :  { %s27_s17 = sshll.u32 %s316_s16, 4  ;;  %s28_s17 = int_to_ptr.vmem [resolvable:$true] %s27_s17 }
  0x10   :  { %s287_s18 = scalar_lea.vmem %s28_s17, 2048  ;;  %p292_p6 = scmp.lt.s32.totalorder %s28_s17, %s28_s17 }
  0x11   :  { %p288_p5 = scmp.ne.s32.totalorder %s28_s17, %s287_s18  ;;  %p293_p7 = scmp.lt.s32.totalorder %s287_s18, %s287_s18 }
  0x13   :  { %p294_p8 = por %p293_p7, %p292_p6 }
  0x15   :  { %p295_p9 = pnand %p294_p8, %p288_p5 }
  0x17   :  { %298 = shalt.err (!%p295_p9)
}
  0x18   :  { %33 = dma.hbm_to_vmem [thread:$0]  %s343_s1, 2048, %s28_s17, [#allocation8], %s314_s12, %s314_s12, %s315_s13  }
  0x19   :  { %307 = dma.done.wait [#allocation5], 2048  }
  0x1a   :  { %308 = vsyncadd [#allocation5], 4294965248 }
  0x1b   :  { %309 = dma.done.wait [#allocation8], 2048  }
  0x1c   :  { %310 = vsyncadd [#allocation8], 4294965248  ;;  %v52_v0 = vld [vmem:[#allocation4] sm:$0xff]  ;;  %v53_v1 = vld [vmem:[#allocation4 + $0x8] sm:$0xff]  ;;  %s317_s21 = smov [#allocation9]  }
  0x1d   :  { %v54_v2 = vld [vmem:[#allocation4 + $0x10] sm:$0xff]  ;;  %v55_v3 = vld [vmem:[#allocation4 + $0x18] sm:$0xff]  ;;  %v56_v4 = vld [vmem:[#allocation4 + $0x20] sm:$0xff]  ;;  %v68_v6 = vmul.f32 %v52_v0, %v52_v0  ;;  %v69_v7 = vmul.f32 %v53_v1, %v53_v1 }
  0x1e   :  { %v57_v5 = vld [vmem:[#allocation4 + $0x28] sm:$0xff]  ;;  %v58_v8 = vld [vmem:[#allocation4 + $0x30] sm:$0xff]  ;;  %v59_v9 = vld [vmem:[#allocation4 + $0x38] sm:$0xff]  ;;  %v70_v11 = vmul.f32 %v54_v2, %v54_v2  ;;  %v71_v12 = vmul.f32 %v55_v3, %v55_v3  ;;  %v72_v13 = vmul.f32 %v56_v4, %v56_v4 }
  0x1f   :  { %v60_v10 = vld [vmem:[#allocation4 + $0x40] sm:$0xff]  ;;  %v73_v14 = vmul.f32 %v57_v5, %v57_v5  ;;  %v61_v15 = vld [vmem:[#allocation4 + $0x48] sm:$0xff]  ;;  %v62_v16 = vld [vmem:[#allocation4 + $0x50] sm:$0xff]  ;;  %v74_v18 = vmul.f32 %v58_v8, %v58_v8  ;;  %v75_v19 = vmul.f32 %v59_v9, %v59_v9 }
  0x20   :  { %v63_v17 = vld [vmem:[#allocation4 + $0x58] sm:$0xff]  ;;  %v76_v20 = vmul.f32 %v60_v10, %v60_v10  ;;  %v64_v21 = vld [vmem:[#allocation4 + $0x60] sm:$0xff]  ;;  %v65_v22 = vld [vmem:[#allocation4 + $0x68] sm:$0xff]  ;;  %v77_v24 = vmul.f32 %v61_v15, %v61_v15  ;;  %v78_v25 = vmul.f32 %v62_v16, %v62_v16  ;;  %v84_v27 = vadd.f32 %v72_v13, %v68_v6 }
  0x21   :  { %v66_v23 = vld [vmem:[#allocation4 + $0x70] sm:$0xff]  ;;  %v79_v26 = vmul.f32 %v63_v17, %v63_v17  ;;  %v67_v28 = vld [vmem:[#allocation4 + $0x78] sm:$0xff]  ;;  %v80_v29 = vmul.f32 %v64_v21, %v64_v21  ;;  %v81_v30 = vmul.f32 %v65_v22, %v65_v22  ;;  %v87_v32 = vadd.f32 %v73_v14, %v69_v7  ;;  %v108_v33 = vld [vmem:[#allocation7] sm:$0xff] }
  0x22   :  { %v82_v31 = vmul.f32 %v66_v23, %v66_v23  ;;  %v109_v34 = vld [vmem:[#allocation7 + $0x8] sm:$0xff]  ;;  %v83_v35 = vmul.f32 %v67_v28, %v67_v28  ;;  %v85_v36 = vadd.f32 %v84_v27, %v76_v20  ;;  %v90_v37 = vadd.f32 %v74_v18, %v70_v11  ;;  %v110_v39 = vld [vmem:[#allocation7 + $0x10] sm:$0xff]  ;;  %v111_v40 = vld [vmem:[#allocation7 + $0x18] sm:$0xff] }
  0x23   :  { %v93_v38 = vadd.f32 %v75_v19, %v71_v12  ;;  %v112_v41 = vld [vmem:[#allocation7 + $0x20] sm:$0xff]  ;;  %v88_v42 = vadd.f32 %v87_v32, %v77_v24  ;;  %v113_v43 = vld [vmem:[#allocation7 + $0x28] sm:$0xff]  ;;  %v114_v44 = vld [vmem:[#allocation7 + $0x30] sm:$0xff]  ;;  %v234_v46 = vadd.f32 -1.0, %v108_v33  ;;  %v235_v47 = vadd.f32 -1.0, %v109_v34 }
  0x24   :  { %v115_v45 = vld [vmem:[#allocation7 + $0x38] sm:$0xff]  ;;  %v236_v48 = vadd.f32 -1.0, %v110_v39  ;;  %v86_v49 = vadd.f32 %v85_v36, %v80_v29  ;;  %v91_v50 = vadd.f32 %v90_v37, %v78_v25  ;;  %v116_v52 = vld [vmem:[#allocation7 + $0x40] sm:$0xff]  ;;  %v117_v53 = vld [vmem:[#allocation7 + $0x48] sm:$0xff]  ;;  %v237_v55 = vadd.f32 -1.0, %v111_v40 }
  0x25   :  { %v94_v51 = vadd.f32 %v93_v38, %v79_v26  ;;  %v118_v54 = vld [vmem:[#allocation7 + $0x50] sm:$0xff]  ;;  %v89_v56 = vadd.f32 %v88_v42, %v81_v30  ;;  %v119_v57 = vld [vmem:[#allocation7 + $0x58] sm:$0xff]  ;;  %v120_v58 = vld [vmem:[#allocation7 + $0x60] sm:$0xff]  ;;  %v238_v60 = vadd.f32 -1.0, %v112_v41  ;;  %v239_v61 = vadd.f32 -1.0, %v113_v43 }
  0x26   :  { %v121_v59 = vld [vmem:[#allocation7 + $0x68] sm:$0xff]  ;;  %v240_v62 = vadd.f32 -1.0, %v114_v44  ;;  %v92_v63 = vadd.f32 %v91_v50, %v82_v31  ;;  %v122_v1 = vld [vmem:[#allocation7 + $0x70] sm:$0xff]  ;;  %v123_v2 = vld [vmem:[#allocation7 + $0x78] sm:$0xff]  ;;  %v241_v3 = vadd.f32 -1.0, %v115_v45  ;;  %v242_v4 = vadd.f32 -1.0, %v116_v52 }
  0x27   :  { %v95_v0 = vadd.f32 %v94_v51, %v83_v35  ;;  %v187_v5 = vadd.f32 %v89_v56, %v86_v49  ;;  %v243_v6 = vadd.f32 -1.0, %v117_v53  ;;  %v244_v7 = vadd.f32 -1.0, %v118_v54 }
  0x28   :  { %v245_v8 = vadd.f32 -1.0, %v119_v57  ;;  %v246_v9 = vadd.f32 -1.0, %v120_v58  ;;  %v247_v10 = vadd.f32 -1.0, %v121_v59  ;;  %v248_v11 = vadd.f32 -1.0, %v122_v1 }
  0x29   :  { %v249_v12 = vadd.f32 -1.0, %v123_v2  ;;  %v188_v13 = vadd.f32 %v187_v5, %v92_v63  ;;  %v140_v14 = vmul.f32 %v234_v46, %v234_v46  ;;  %v141_v15 = vmul.f32 %v235_v47, %v235_v47 }
  0x2a   :  { %v142_v16 = vmul.f32 %v236_v48, %v236_v48  ;;  %v143_v17 = vmul.f32 %v237_v55, %v237_v55  ;;  %v144_v18 = vmul.f32 %v238_v60, %v238_v60  ;;  %v145_v19 = vmul.f32 %v239_v61, %v239_v61 }
  0x2b   :  { %v146_v20 = vmul.f32 %v240_v62, %v240_v62  ;;  %v189_v21 = vadd.f32 %v188_v13, %v95_v0  ;;  %v147_v22 = vmul.f32 %v241_v3, %v241_v3  ;;  %v148_v23 = vmul.f32 %v242_v4, %v242_v4 }
  0x2c   :  { %v149_v24 = vmul.f32 %v243_v6, %v243_v6  ;;  %v150_v25 = vmul.f32 %v244_v7, %v244_v7  ;;  %v151_v26 = vmul.f32 %v245_v8, %v245_v8  ;;  %v152_v27 = vmul.f32 %v246_v9, %v246_v9 }
  0x2d   :  { %190 = vadd.xlane.f32.xlu0 %v189_v21  ;;  %v153_v28 = vmul.f32 %v247_v10, %v247_v10  ;;  %v156_v29 = vadd.f32 %v144_v18, %v140_v14  ;;  %v159_v30 = vadd.f32 %v145_v19, %v141_v15  ;;  %v154_v31 = vmul.f32 %v248_v11, %v248_v11 }
  0x2e   :  { %v162_v32 = vadd.f32 %v146_v20, %v142_v16  ;;  %v165_v33 = vadd.f32 %v147_v22, %v143_v17  ;;  %v155_v34 = vmul.f32 %v249_v12, %v249_v12 }
  0x2f   :  { %v157_v35 = vadd.f32 %v156_v29, %v148_v23  ;;  %v160_v36 = vadd.f32 %v159_v30, %v149_v24 }
  0x30   :  { %v163_v37 = vadd.f32 %v162_v32, %v150_v25  ;;  %v166_v38 = vadd.f32 %v165_v33, %v151_v26 }
  0x31   :  { %v158_v39 = vadd.f32 %v157_v35, %v152_v27  ;;  %v161_v40 = vadd.f32 %v160_v36, %v153_v28 }
  0x32   :  { %v164_v41 = vadd.f32 %v163_v37, %v154_v31  ;;  %v167_v42 = vadd.f32 %v166_v38, %v155_v34 }
  0x33   :  { %v205_v43 = vadd.f32 %v161_v40, %v158_v39 }
  0x35   :  { %v206_v44 = vadd.f32 %v205_v43, %v164_v41 }
  0x37   :  { %v207_v45 = vadd.f32 %v206_v44, %v167_v42 }
  0x39   :  { %208 = vadd.xlane.f32.xlu0 %v207_v45 }
  0xb6   :  { %v191_v46 = vpop.xlane.xlu0 %190 }
  0xb7   :  { %v192_v47 = vrot.slane %v191_v46, 4 }
  0xb9   :  { %v193_v48 = vadd.f32 %v192_v47, %v191_v46 }
  0xbb   :  { %v194_v49 = vrot.slane %v193_v48, 2 }
  0xbd   :  { %v195_v50 = vadd.f32 %v194_v49, %v193_v48 }
  0xbf   :  { %v196_v51 = vrot.slane %v195_v50, 1 }
  0xc1   :  { %v197_v52 = vadd.f32 %v196_v51, %v195_v50 }
  0xc2   :  { %v209_v53 = vpop.xlane.xlu0 %208 }
  0xc3   :  { %v210_v54 = vrot.slane %v209_v53, 4  ;;  %250 = vpush %v197_v52 }
  0xc5   :  { %v211_v55 = vadd.f32 %v210_v54, %v209_v53 }
  0xc7   :  { %v212_v56 = vrot.slane %v211_v55, 2 }
  0xc9   :  { %v213_v57 = vadd.f32 %v212_v56, %v211_v55 }
  0xcb   :  { %v214_v58 = vrot.slane %v213_v57, 1 }
  0xcd   :  { %v215_v59 = vadd.f32 %v214_v58, %v213_v57 }
  0xcf   :  { %252 = vpush %v215_v59 }
  0xf4   :  { %s251_s0 = spop %250 }
  0xf5   :  { %200 = sst [smem:[#allocation9]] %s251_s0 }
 0x100   :  { %s253_s1 = spop %252 }
 0x101   :  { %218 = sst [smem:[#allocation9 + $0x1]] %s253_s1 }
 0x102   :  { %226 = dma.smem_to_hbm %s317_s21, 16, %s344_s2, [#allocation6]  }
 0x103   :  { %311 = dma.done.wait [#allocation6], 16  }
 0x104   :  { %312 = vsyncadd [#allocation6], 4294967280 }
 0x105   :  { %230 = sfence }
 0x106   :  { %231 = vsyncpa [#allocation5], 1 }
 0x107   :  { %232 = vsyncpa [#allocation8], 1 }
 0x108   :  { %233 = vsyncpa [#allocation6], 1 }

</bundles_post_ra>
